<compile_context>
chip_gen: v7x
topology: tpu7x:2x2x1
jax: 0.10.0
libtpu: 0.0.40
codegen_flags: <defaults>
</compile_context>

<pallas_src>
import jax
import jax.numpy as jnp
from jax.experimental import pallas as pl
from jax.experimental.pallas import tpu as pltpu


def _pick_chunk(n, max_chunk):
    """Largest divisor of n that is <= max_chunk."""
    for c in range(min(n, max_chunk), 0, -1):
        if n % c == 0:
            return c
    return 1


# ----------------------------------------------------------------------------
# Dense input projection: gi = x2 @ W + b   (x2 = x reshaped to [T*B, D])
# One MXU-shaped GEMM instead of 3*T tiny dots inside the recurrence.
# ----------------------------------------------------------------------------
def _input_proj_kernel(x_ref, w_ref, b_ref, o_ref):
    w = w_ref[...]
    o_ref[...] = (jnp.dot(x_ref[...].astype(w.dtype), w,
                          preferred_element_type=jnp.float32)
                  + b_ref[...]).astype(o_ref.dtype)


def input_projection(x2, w, b, *, max_rows=512):
    M, D = x2.shape
    N = w.shape[-1]
    rm = _pick_chunk(M, max_rows)
    const = lambda i: (0, 0)
    return pl.pallas_call(
        _input_proj_kernel,
        out_shape=jax.ShapeDtypeStruct((M, N), jnp.float32),
        grid_spec=pltpu.PrefetchScalarGridSpec(
            num_scalar_prefetch=0,
            grid=(M // rm,),
            in_specs=[
                pl.BlockSpec((rm, D), lambda i: (i, 0)),
                pl.BlockSpec((D, N), const),
                pl.BlockSpec((1, N), const),
            ],
            out_specs=pl.BlockSpec((rm, N), lambda i: (i, 0)),
        ),
        compiler_params=pltpu.CompilerParams(dimension_semantics=("parallel",)),
    )(x2, w, b)


# ----------------------------------------------------------------------------
# Encoder GRU: consumes precomputed input gates, single fused h @ [H,3H] dot
# per step, fused output Linear -> lane-dense [B, 2L] (mu | log_sigma).
# ----------------------------------------------------------------------------
def _enc_gru_kernel(gi_ref, whh_ref, bhn_ref, wout_ref, bout_ref, qz_ref, h_scr):
    c = pl.program_id(0)
    tc = gi_ref.shape[0]
    H = h_scr.shape[-1]

    @pl.when(c == 0)
    def _():
        h_scr[...] = jnp.zeros_like(h_scr)

    w_hh = whh_ref[...]          # [H, 3H]  (gate cols: r | z | n)
    b_hn = bhn_ref[...]          # [1, H]

    def step(t, h):
        gx = gi_ref[t]                                           # [B, 3H]
        gh = jnp.dot(h.astype(w_hh.dtype), w_hh,
                     preferred_element_type=jnp.float32)         # [B, 3H]
        r = jax.nn.sigmoid(gx[:, :H] + gh[:, :H])
        zg = jax.nn.sigmoid(gx[:, H:2 * H] + gh[:, H:2 * H])
        n = jnp.tanh(gx[:, 2 * H:] + r * (gh[:, 2 * H:] + b_hn))
        return n + zg * (h - n)

    h = jax.lax.fori_loop(0, tc, step, h_scr[...], unroll=min(tc, 8))
    h_scr[...] = h

    @pl.when(c == pl.num_programs(0) - 1)
    def _():
        w_out = wout_ref[...]                                    # [H, 2L]
        qz_ref[...] = (jnp.dot(h.astype(w_out.dtype), w_out,
                               preferred_element_type=jnp.float32)
                       + bout_ref[...]).astype(qz_ref.dtype)


def encoder_forward(gi, whh_cat, bhn, wout_cat, bout_cat, *, max_chunk=32):
    T, B, H3 = gi.shape
    H = whh_cat.shape[0]
    L2 = wout_cat.shape[-1]
    tc = _pick_chunk(T, max_chunk)
    const2 = lambda c: (0, 0)
    return pl.pallas_call(
        _enc_gru_kernel,
        out_shape=jax.ShapeDtypeStruct((B, L2), jnp.float32),
        grid_spec=pltpu.PrefetchScalarGridSpec(
            num_scalar_prefetch=0,
            grid=(T // tc,),
            in_specs=[
                pl.BlockSpec((tc, B, H3), lambda c: (c, 0, 0)),
                pl.BlockSpec((H, H3), const2),
                pl.BlockSpec((1, H), const2),
                pl.BlockSpec((H, L2), const2),
                pl.BlockSpec((1, L2), const2),
            ],
            out_specs=pl.BlockSpec((B, L2), const2),
            scratch_shapes=[pltpu.VMEM((B, H), jnp.float32)],
        ),
        compiler_params=pltpu.CompilerParams(dimension_semantics=("arbitrary",)),
    )(gi, whh_cat, bhn, wout_cat, bout_cat)


# ----------------------------------------------------------------------------
# Decoder GRU: c==0 prologue does the reparameterization AND the (time-
# constant) input-gate GEMM z @ [L,3H] into a VMEM scratch.  Each timestep
# is one h @ [H,3H] dot + one fused output dot -> lane-dense [tc, B, 2O].
# ----------------------------------------------------------------------------
def _dec_gru_kernel(qz_ref, eps_ref, wih_ref, bi_ref, whh_ref, bhn_ref,
                    wout_ref, bout_ref, z_ref, px_ref, h_scr, gi_scr):
    c = pl.program_id(0)
    tc = px_ref.shape[0]
    H = h_scr.shape[-1]
    L = eps_ref.shape[-1]

    @pl.when(c == 0)
    def _():
        h_scr[...] = jnp.zeros_like(h_scr)
        qz = qz_ref[...]                                         # [B, 2L]
        z = qz[:, :L] + jnp.exp(qz[:, L:]) * eps_ref[...]
        z_ref[...] = z.astype(z_ref.dtype)
        w_ih = wih_ref[...]                                      # [L, 3H]
        gi_scr[...] = (jnp.dot(z.astype(w_ih.dtype), w_ih,
                               preferred_element_type=jnp.float32)
                       + bi_ref[...])

    gi = gi_scr[...]             # [B, 3H], constant over time
    w_hh = whh_ref[...]          # [H, 3H]
    b_hn = bhn_ref[...]          # [1, H]
    w_out = wout_ref[...]        # [H, 2O]
    b_out = bout_ref[...]        # [1, 2O]

    def step(t, h):
        gh = jnp.dot(h.astype(w_hh.dtype), w_hh,
                     preferred_element_type=jnp.float32)         # [B, 3H]
        r = jax.nn.sigmoid(gi[:, :H] + gh[:, :H])
        zg = jax.nn.sigmoid(gi[:, H:2 * H] + gh[:, H:2 * H])
        n = jnp.tanh(gi[:, 2 * H:] + r * (gh[:, 2 * H:] + b_hn))
        h_new = n + zg * (h - n)
        px_ref[t] = (jnp.dot(h_new.astype(w_out.dtype), w_out,
                             preferred_element_type=jnp.float32)
                     + b_out).astype(px_ref.dtype)
        return h_new

    h = jax.lax.fori_loop(0, tc, step, h_scr[...], unroll=min(tc, 8))
    h_scr[...] = h


def decoder_forward(qz_params, eps, wih_cat, bi_cat, whh_cat, bhn,
                    wout_cat, bout_cat, T, *, max_chunk=32):
    B, L2 = qz_params.shape
    L = eps.shape[-1]
    H = whh_cat.shape[0]
    H3 = whh_cat.shape[-1]
    O2 = wout_cat.shape[-1]
    tc = _pick_chunk(T, max_chunk)
    const2 = lambda c: (0, 0)
    return pl.pallas_call(
        _dec_gru_kernel,
        out_shape=(jax.ShapeDtypeStruct((B, L), jnp.float32),
                   jax.ShapeDtypeStruct((T, B, O2), jnp.float32)),
        grid_spec=pltpu.PrefetchScalarGridSpec(
            num_scalar_prefetch=0,
            grid=(T // tc,),
            in_specs=[
                pl.BlockSpec((B, L2), const2),
                pl.BlockSpec((B, L), const2),
                pl.BlockSpec((L, H3), const2),
                pl.BlockSpec((1, H3), const2),
                pl.BlockSpec((H, H3), const2),
                pl.BlockSpec((1, H), const2),
                pl.BlockSpec((H, O2), const2),
                pl.BlockSpec((1, O2), const2),
            ],
            out_specs=(pl.BlockSpec((B, L), const2),
                       pl.BlockSpec((tc, B, O2), lambda c: (c, 0, 0))),
            scratch_shapes=[pltpu.VMEM((B, H), jnp.float32),
                            pltpu.VMEM((B, H3), jnp.float32)],
        ),
        compiler_params=pltpu.CompilerParams(dimension_semantics=("arbitrary",)),
    )(qz_params, eps, wih_cat, bi_cat, whh_cat, bhn, wout_cat, bout_cat)


# ----------------------------------------------------------------------------
# VRAE wrapper (parameter container + forward)
# ----------------------------------------------------------------------------
class VRAEPallas:
    def __init__(self, input_dim, latent_features, encoder_hidden_size,
                 decoder_hidden_size, output_dim=None, key=None,
                 param_dtype=jnp.float32):
        # param_dtype=jnp.bfloat16 halves weight DMA/VMEM on v6e/v7x; the
        # activations stay f32 and every dot accumulates in f32.
        self.input_dim = input_dim
        self.latent_features = latent_features
        self.encoder_hidden_size = encoder_hidden_size
        self.decoder_hidden_size = decoder_hidden_size
        self.output_dim = input_dim if output_dim is None else output_dim
        self.param_dtype = param_dtype

        if key is None:
            key = jax.random.PRNGKey(0)
        ks = jax.random.split(key, 12)
        s = 0.1

        def rnd(k, shape):
            return (s * jax.random.normal(k, shape)).astype(jnp.float32)

        HE, HD, L, O = encoder_hidden_size, decoder_hidden_size, \
            latent_features, self.output_dim

        # --- raw parameters in PyTorch nn.GRU / nn.Linear layout ---
        enc_w_ih = rnd(ks[0], (3 * HE, input_dim))
        enc_w_hh = rnd(ks[1], (3 * HE, HE))
        enc_b_ih = rnd(ks[2], (1, 3 * HE))
        enc_b_hh = rnd(ks[3], (1, 3 * HE))
        enc_out_w = rnd(ks[4], (2 * L, HE))
        enc_out_b = rnd(ks[5], (1, 2 * L))
        dec_w_ih = rnd(ks[6], (3 * HD, L))
        dec_w_hh = rnd(ks[7], (3 * HD, HD))
        dec_b_ih = rnd(ks[8], (1, 3 * HD))
        dec_b_hh = rnd(ks[9], (1, 3 * HD))
        dec_out_w = rnd(ks[10], (2 * O, HD))
        dec_out_b = rnd(ks[11], (1, 2 * O))

        def cols3(b, H):  # PyTorch gate order: r | z | n
            return b[:, :H], b[:, H:2 * H], b[:, 2 * H:]

        pd = param_dtype

        # --- encoder: pre-transposed, gate-concatenated (host-side, once) ---
        # W_ih^T: [D, 3HE] with columns already in r | z | n order.
        self.enc_wih_cat = enc_w_ih.T.astype(pd)                  # [D, 3HE]
        self.enc_whh_cat = enc_w_hh.T.astype(pd)                  # [HE, 3HE]
        b_ir, b_iz, b_in = cols3(enc_b_ih, HE)
        b_hr, b_hz, b_hn = cols3(enc_b_hh, HE)
        # r/z biases fold into the input projection; b_in too (b_hn must stay
        # inside the recurrence, multiplied by r).
        self.enc_bi_cat = jnp.concatenate([b_ir + b_hr, b_iz + b_hz, b_in],
                                          axis=-1)                # [1, 3HE]
        self.enc_bhn = b_hn                                       # [1, HE]
        self.enc_wout_cat = enc_out_w.T.astype(pd)                # [HE, 2L]
        self.enc_bout_cat = enc_out_b                             # [1, 2L]

        # --- decoder: pre-transposed, gate-concatenated ---
        self.dec_wih_cat = dec_w_ih.T.astype(pd)                  # [L, 3HD]
        self.dec_whh_cat = dec_w_hh.T.astype(pd)                  # [HD, 3HD]
        db_ir, db_iz, db_in = cols3(dec_b_ih, HD)
        db_hr, db_hz, db_hn = cols3(dec_b_hh, HD)
        self.dec_bi_cat = jnp.concatenate([db_ir + db_hr, db_iz + db_hz, db_in],
                                          axis=-1)                # [1, 3HD]
        self.dec_bhn = db_hn                                      # [1, HD]
        self.dec_wout_cat = dec_out_w.T.astype(pd)                # [HD, 2O]
        self.dec_bout_cat = dec_out_b                             # [1, 2O]

        # prior_params buffer: zeros [1, 2 * latent_features]
        self.prior_params = jnp.zeros((1, 2 * L), jnp.float32)

    def forward(self, x, eps):
        # x: [T, B, input_dim]; eps: [B, latent_features] (rsample noise)
        # TODO(synk): variable-length PackedSequence masking not implemented;
        # all sequences are treated as full length T.
        T, B, D = x.shape
        L = self.latent_features

        # ---- encoder input gates: one dense [T*B, D] x [D, 3HE] GEMM ----
        gi_x = input_projection(x.reshape(T * B, D),
                                self.enc_wih_cat, self.enc_bi_cat)
        gi_x = gi_x.reshape(T, B, 3 * self.encoder_hidden_size)

        # ---- posterior q(z|x): GRU recurrence + fused output Linear ----
        qz_params = encoder_forward(gi_x, self.enc_whh_cat, self.enc_bhn,
                                    self.enc_wout_cat, self.enc_bout_cat)

        # ---- rsample + observation model p(x|z) (fused in one kernel) ----
        z, px_params = decoder_forward(qz_params, eps,
                                       self.dec_wih_cat, self.dec_bi_cat,
                                       self.dec_whh_cat, self.dec_bhn,
                                       self.dec_wout_cat, self.dec_bout_cat, T)

        qz_mu, qz_log_sigma = jnp.split(qz_params, 2, axis=-1)
        px_mu, px_log_sigma = jnp.split(px_params, 2, axis=-1)

        # ---- prior p(z) ----
        prior = jnp.broadcast_to(self.prior_params, (B, 2 * L))
        pz_mu, pz_log_sigma = jnp.split(prior, 2, axis=-1)

        return {
            "px": {"mu": px_mu, "log_sigma": px_log_sigma},
            "pz": {"mu": pz_mu, "log_sigma": pz_log_sigma},
            "qz": {"mu": qz_mu, "log_sigma": qz_log_sigma},
            "z": z,
        }


# ----------------------------------------------------------------------------
if __name__ == "__main__":
    T, B = 8, 2
    input_dim = 4
    latent_features = 4
    enc_hidden = 16
    dec_hidden = 16

    key = jax.random.PRNGKey(0)
    kx, keps, kparams = jax.random.split(key, 3)

    x = jax.random.normal(kx, (T, B, input_dim), dtype=jnp.float32)
    eps = jax.random.normal(keps, (B, latent_features), dtype=jnp.float32)

    model = VRAEPallas(input_dim, latent_features, enc_hidden, dec_hidden,
                       key=kparams)

    out = model.forward(x, eps)
    out = jax.block_until_ready(out)

    assert out["z"].shape == (B, latent_features)
    assert out["qz"]["mu"].shape == (B, latent_features)
    assert out["qz"]["log_sigma"].shape == (B, latent_features)
    assert out["pz"]["mu"].shape == (B, latent_features)
    assert out["pz"]["log_sigma"].shape == (B, latent_features)
    assert out["px"]["mu"].shape == (T, B, input_dim)
    assert out["px"]["log_sigma"].shape == (T, B, input_dim)
    assert all(jnp.all(jnp.isfinite(v)) for v in
               (out["z"], out["qz"]["mu"], out["px"]["mu"],
                out["px"]["log_sigma"]))

    print("KERNEL_OK")
</pallas_src>

<mosaic_0001>
module attributes {stable_mosaic.version = 11 : i64} {
  func.func @_input_proj_kernel(%arg0: i32, %arg1: memref<16x4xf32, #tpu.memory_space<vmem>>, %arg2: memref<4x48xf32, #tpu.memory_space<vmem>>, %arg3: memref<1x48xf32, #tpu.memory_space<vmem>>, %arg4: memref<16x48xf32, #tpu.memory_space<vmem>>) attributes {dimension_semantics = [#tpu.dimension_semantics<parallel>], iteration_bounds = array<i64: 1>, scalar_prefetch = 0 : i64, scratch_operands = 0 : i64, tpu.core_type = #tpu.core_type<tc>, window_params = [{transform_indices = @transform_0, window_bounds = array<i64: 16, 4>}, {pipeline_mode = #tpu.pipeline_mode<synchronous>, transform_indices = @transform_1, window_bounds = array<i64: 4, 48>}, {pipeline_mode = #tpu.pipeline_mode<synchronous>, transform_indices = @transform_2, window_bounds = array<i64: 1, 48>}, {transform_indices = @transform_3, window_bounds = array<i64: 16, 48>}]} {
    %c0 = arith.constant 0 : index
    %c0_0 = arith.constant 0 : index
    %0 = vector.load %arg2[%c0, %c0_0] : memref<4x48xf32, #tpu.memory_space<vmem>>, vector<4x48xf32>
    %c0_1 = arith.constant 0 : index
    %c0_2 = arith.constant 0 : index
    %1 = vector.load %arg1[%c0_1, %c0_2] : memref<16x4xf32, #tpu.memory_space<vmem>>, vector<16x4xf32>
    %cst = arith.constant dense<0.000000e+00> : vector<16x48xf32>
    %2 = tpu.matmul %1, %0, %cst {dimension_numbers = #tpu.dot_dimension_numbers<[1], [0], [0], [1], [0, 0, 1, 1], [], []>} : vector<16x4xf32>, vector<4x48xf32>, vector<16x48xf32> -> vector<16x48xf32>
    %c0_3 = arith.constant 0 : index
    %c0_4 = arith.constant 0 : index
    %3 = vector.load %arg3[%c0_3, %c0_4] : memref<1x48xf32, #tpu.memory_space<vmem>>, vector<1x48xf32>
    %4 = vector.broadcast %3 : vector<1x48xf32> to vector<16x48xf32>
    %5 = arith.addf %2, %4 : vector<16x48xf32>
    %c0_5 = arith.constant 0 : index
    %c0_6 = arith.constant 0 : index
    %6 = vector.load %arg4[%c0_5, %c0_6] : memref<16x48xf32, #tpu.memory_space<vmem>>, vector<16x48xf32>
    tpu.vector_store %arg4[%c0_5, %c0_6], %5 {strides = array<i32>} : memref<16x48xf32, #tpu.memory_space<vmem>>, vector<16x48xf32>,
    return
  }
  func.func @transform_0(%arg0: i32) -> (i32, i32) {
    %c0_i32 = arith.constant 0 : i32
    %c0_i32_0 = arith.constant 0 : i32
    return %arg0, %c0_i32 : i32, i32
  }
  func.func @transform_1(%arg0: i32) -> (i32, i32) {
    %c0_i32 = arith.constant 0 : i32
    %c0_i32_0 = arith.constant 0 : i32
    %c0_i32_1 = arith.constant 0 : i32
    return %c0_i32, %c0_i32_0 : i32, i32
  }
  func.func @transform_2(%arg0: i32) -> (i32, i32) {
    %c0_i32 = arith.constant 0 : i32
    %c0_i32_0 = arith.constant 0 : i32
    %c0_i32_1 = arith.constant 0 : i32
    return %c0_i32, %c0_i32_0 : i32, i32
  }
  func.func @transform_3(%arg0: i32) -> (i32, i32) {
    %c0_i32 = arith.constant 0 : i32
    %c0_i32_0 = arith.constant 0 : i32
    return %arg0, %c0_i32 : i32, i32
  }
}

</mosaic_0001>

<bundles_post_ra>
// kernel: tpu_custom_call.1
= control target key start
LH: loop header
LB: loop body
LE: loop exit
PB: predicated region body
PF: predicated region fallthrough
CT: control target
= control target key end

     0   :  { %vm32_vm0 = vcmask 1043456   ;;  %vm25_vm1 = vcmask 31744   ;;  %s216_s0 = inlined_call_operand.vmem [shape: f32[16,4], index: 0, kind: input, shape index: {}]   ;;  %s217_s1 = inlined_call_operand.vmem [shape: f32[4,48], index: 1, kind: input, shape index: {}]   ;;  %s218_s2 = inlined_call_operand.vmem [shape: f32[1,48], index: 2, kind: input, shape index: {}]   ;;  %s219_s3 = inlined_call_operand.hbm [shape: f32[16,48], index: 3, kind: output, shape index: {}]  }
   0x1   :  { %v15_v0 = vld [vmem:[%s217_s1] sm:$0xf]  ;;  %v17_v2 = vld [vmem:[%s216_s0 + $0x8] sm:$0xff] }
   0x2   :  { %v16_v1 = vld [vmem:[%s216_s0] sm:$0xff]  ;;  %137 = vmatprep.subr.msk.mxu0 %vm32_vm0, %v15_v0 }
   0x3   :  { %139 = vmatprep.mubr.msk.f32.mxu0 %vm25_vm1, %v16_v1 }
   0x4   :  { %8 = vsyncpa [#allocation3], 0  ;;  %138 = vmatpush3.msk.msra.mxu0 %vm32_vm0, %v15_v0  ;;  %v130_v3 = vld [vmem:[%s218_s2] ss:$0 sm:$0xff]  ;;  %s169_s1 = smov [#allocation2]   ;;  %vm111_vm2 = vcmask 392192  }
   0x5   :  { %140 = vmatmul.mubr.msk.f32.vlgmr.msra.gmra.mrb[0].mxu0 %vm25_vm1, %v17_v2  ;;  %s119_s20 = sshll.u32 %s169_s1, 4  ;;  %s120_s20 = int_to_ptr.vmem [resolvable:$true] %s119_s20 }
   0x6   :  { %s145_s0 = scalar_lea.vmem %s120_s20, 256  ;;  %p150_p1 = scmp.lt.s32.totalorder %s120_s20, %s120_s20 }
   0x7   :  { %p146_p0 = scmp.ne.s32.totalorder %s120_s20, %s145_s0  ;;  %p151_p2 = scmp.lt.s32.totalorder %s145_s0, %s145_s0 }
   0x9   :  { %p152_p3 = por %p151_p2, %p150_p1 }
   0xb   :  { %p153_p4 = pnand %p152_p3, %p146_p0 }
  0xd8   :  { %v141_v4 = vpop.f32.mrb[0].mxu0 }
  0xd9   :  { %v108_v5 = vadd.f32 %v141_v4, %v130_v3  ;;  %v102_v6 = vpop.f32.mrb[1].mxu0 }
  0xda   :  { %v103_v7 = vadd.f32 %v130_v3, %v102_v6 }
  0xdb   :  { %113 = vst.msk [vmem:[#allocation2 + $0x8] sm:$0xff] %vm111_vm2, %v108_v5 }
  0xdc   :  { %112 = vst.msk [vmem:[#allocation2] sm:$0xff] %vm111_vm2, %v103_v7 }
  0xdd   :  { %156 = shalt.err (!%p153_p4)
}
  0xde   :  { %s157_s2 = scalar_lea.hbm %s219_s3, 256 }
  0xdf   :  { %p158_p5 = scmp.ne.s32.totalorder %s219_s3, %s157_s2  ;;  %p161_p6 = scmp.lt.u32.totalorder %s157_s2, %s219_s3 }
  0xe1   :  { %p163_p7 = pnand %p161_p6, %p158_p5 }
  0xe3   :  { %166 = shalt.err (!%p163_p7)
}
  0xe4   :  { %s170_s27 = smov 128   ;;  %s171_s28 = smov 8  }
  0xe5   :  { %125 = dma.vmem_to_hbm [thread:$0]  %s120_s20, 256, %s219_s3, [#allocation3], %s170_s27, %s170_s27, %s171_s28  }
  0xe6   :  { %167 = dma.done.wait [#allocation3], 256  }
  0xe7   :  { %168 = vsyncadd [#allocation3], 4294967040 }
  0xe8   :  { %129 = vsyncpa [#allocation3], 1 }

</bundles_post_ra>
